<compile_context>
chip_gen: v5e
topology: v5e:2x2
jax: 0.10.0
libtpu: 0.0.40
codegen_flags: <defaults>
</compile_context>

<pallas_src>
import functools

import jax
import jax.numpy as jnp
from jax import lax
from jax.experimental import pallas as pl
from jax.experimental.pallas import tpu as pltpu

_LANE_CANDIDATES = (512, 256, 128)       # lane-dense widths (multiples of 128)
_DEFAULT_LANE_W = 512
_TARGET_BLOCK_BYTES = 4 * 1024 * 1024    # per-input block size (native dtype)
_TILE_GRAIN = 128                        # row granularity of large tiles
_CHUNK_CANDIDATES = (256, 128, 64, 32, 16, 8)
_BCE_IN_KERNEL_MAX = 1 << 18             # larger heads -> wrapper BCE (VMEM guard)
_VMEM_LIMIT_BYTES = 32 * 1024 * 1024


def _cdiv(a, b):
    return -(-a // b)


def _round_up(x, m):
    return _cdiv(x, m) * m


def _round_down(x, m):
    return (x // m) * m


def _sublane_mult(*dtypes):
    """Sublane multiple for clean packed layouts: 8 (f32), 16 (bf16), 32 (int8/fp8)."""
    m = 8
    for d in dtypes:
        m = max(m, 8 * max(1, 4 // jnp.dtype(d).itemsize))
    return m


def _num_parallel_splits():
    """2 on dual-TensorCore v7x, else 1 (v5e/v6e have a single TensorCore)."""
    try:
        kind = jax.devices()[0].device_kind.lower()
    except Exception:
        return 1
    return 2 if "v7" in kind else 1


def _bce_with_logits_mean(pred, labels, pos_weight):
    """Numerically stable BCEWithLogits(pos_weight) mean, plain JAX (fallback/reference)."""
    x = pred.astype(jnp.float32).reshape(-1)
    y = labels.astype(jnp.float32).reshape(-1)
    sp = jnp.maximum(-x, 0.0) + jnp.log1p(jnp.exp(-jnp.abs(x)))
    return jnp.mean((1.0 - y) * x + (1.0 + (pos_weight - 1.0) * y) * sp)


def _make_kernel(*, tile_r, chunk_r, lane_w, include_bce, n_bce, pos_weight):
    """Kernel closure; all sizes are baked-in Python constants."""
    n_chunks = tile_r // chunk_r
    n_lane_groups = lane_w // 128

    def _mse_tile(recon_ref, xtrue_ref):
        # Chunked reduction: bounds the f32 temporaries to one (chunk_r, W) slab,
        # accumulating into an (8, W) f32 vreg-resident carry.  Pure VPU work,
        # hidden under the block DMA.
        def chunk(c, acc):
            off = pl.multiple_of(c * chunk_r, chunk_r)
            r = recon_ref[pl.ds(off, chunk_r), :].astype(jnp.float32)
            t = xtrue_ref[pl.ds(off, chunk_r), :].astype(jnp.float32)
            d = r - t
            return acc + (d * d).reshape(chunk_r // 8, 8, lane_w).sum(axis=0)

        acc = lax.fori_loop(0, n_chunks, chunk,
                            jnp.zeros((8, lane_w), jnp.float32))
        # Fold lane groups down to one (8, 128) per-lane partial sum (vreg adds only).
        lane = acc[:, 0:128]
        for j in range(1, n_lane_groups):
            lane = lane + acc[:, j * 128:(j + 1) * 128]
        return lane

    def _bce_slab(pred_ref, labels_ref):
        # BCEWithLogits (stable, pos_weight) on the zero-padded (rb, 128) slab.
        x = pred_ref[...].astype(jnp.float32)
        y = labels_ref[...].astype(jnp.float32)
        sp = jnp.maximum(-x, 0.0) + jnp.log1p(jnp.exp(-jnp.abs(x)))
        per = (1.0 - y) * x + (1.0 + (pos_weight - 1.0) * y) * sp
        r_idx = lax.broadcasted_iota(jnp.int32, per.shape, 0)
        c_idx = lax.broadcasted_iota(jnp.int32, per.shape, 1)
        per = jnp.where(r_idx * 128 + c_idx < n_bce, per, 0.0)   # mask padding
        return per.reshape(per.shape[0] // 8, 8, 128).sum(axis=0)

    def _body(recon_ref, xtrue_ref, pred_ref, labels_ref, out_ref):
        p = pl.program_id(0)   # parallel split (v7x TensorCores)
        i = pl.program_id(1)   # reduction tile; output block resident across i

        @pl.when(i == 0)
        def _init():
            out_ref[0, 0] = jnp.zeros((8, 128), jnp.float32)
            if include_bce:
                out_ref[0, 1] = jnp.zeros((8, 128), jnp.float32)

        if include_bce:
            @pl.when(jnp.logical_and(i == 0, p == 0))
            def _bce():
                out_ref[0, 1] = _bce_slab(pred_ref, labels_ref)

        out_ref[0, 0] += _mse_tile(recon_ref, xtrue_ref)

    if include_bce:
        def kernel(recon_ref, xtrue_ref, pred_ref, labels_ref, out_ref):
            _body(recon_ref, xtrue_ref, pred_ref, labels_ref, out_ref)
    else:
        def kernel(recon_ref, xtrue_ref, out_ref):
            _body(recon_ref, xtrue_ref, None, None, out_ref)

    return kernel


@functools.partial(jax.jit, static_argnames=("recon_weight", "class_weight"))
def weighted_loss(reconstruct, pred, x_true, labels, *, recon_weight, class_weight):
    """Pallas implementation of WeightedLoss.forward.

    reconstruct, x_true : (B, C, T) floats (any float dtype; cast in-kernel)
    pred, labels        : (B, P)    logits / {0,1} targets
    Returns (loss, recon_loss, class_loss) as on-device scalars.
    """
    n_recon = reconstruct.size
    n_bce = pred.size
    pos_weight = float(class_weight)

    mult = _sublane_mult(reconstruct.dtype, x_true.dtype)
    itemsize = max(jnp.dtype(reconstruct.dtype).itemsize,
                   jnp.dtype(x_true.dtype).itemsize)

    # ---------------- reconstruction (MSE): lane-dense view, no big pads ----------
    recon_all = reconstruct.reshape(-1)   # free (contiguous)
    xtrue_all = x_true.reshape(-1)

    lane_w = next((w for w in _LANE_CANDIDATES if n_recon % w == 0), _DEFAULT_LANE_W)
    rows = n_recon // lane_w

    if rows < mult:
        # Tiny input: zero-pad to one minimal tile (<= mult*lane_w elems; negligible).
        rows_p = max(mult, _round_up(_cdiv(n_recon, lane_w), mult))
        pad = rows_p * lane_w - n_recon
        recon2d = jnp.pad(recon_all, (0, pad)).reshape(rows_p, lane_w)
        xtrue2d = jnp.pad(xtrue_all, (0, pad)).reshape(rows_p, lane_w)
        num_rows = rows_p
    else:
        n_body = rows * lane_w
        if n_body != n_recon:
            # Ragged (< lane_w) remainder exists -> prefix view needs a slice.
            # TODO(synk): XLA may materialize this prefix slice as one streaming copy;
            # a fully copy-free ragged path needs a manual-DMA kernel over 1D pl.ANY refs.
            recon_body, xtrue_body = recon_all[:n_body], xtrue_all[:n_body]
        else:
            recon_body, xtrue_body = recon_all, xtrue_all   # zero-copy reshape below
        recon2d = recon_body.reshape(rows, lane_w)
        xtrue2d = xtrue_body.reshape(rows, lane_w)
        num_rows = rows

    # ---------------- tiling: the grid covers only full, in-bounds tiles ----------
    cap_rows = max(_TILE_GRAIN,
                   _round_down(_TARGET_BLOCK_BYTES // (lane_w * itemsize), _TILE_GRAIN))
    if num_rows <= cap_rows:
        tile_r = _round_down(num_rows, mult)                      # single tile
    else:
        tile_r = max(_TILE_GRAIN,
                     _round_down(num_rows // _cdiv(num_rows, cap_rows), _TILE_GRAIN))
    nt_total = num_rows // tile_r

    nsplit = _num_parallel_splits()
    if nt_total < 2:
        nsplit = 1
    nt = nt_total // nsplit
    covered_rows = nsplit * nt * tile_r
    chunk_r = next(c for c in _CHUNK_CANDIDATES if tile_r % c == 0)

    # Elements not covered by the kernel grid (< one tile + ragged tail): reduced
    # here; XLA fuses the slice into the reduction so only these bytes are re-read.
    n_kernel = covered_rows * lane_w
    if n_kernel < n_recon:
        tr = recon_all[n_kernel:].astype(jnp.float32)
        tx = xtrue_all[n_kernel:].astype(jnp.float32)
        extra_sq = jnp.sum((tr - tx) ** 2)
    else:
        extra_sq = jnp.zeros((), jnp.float32)

    # ---------------- classification head (BCE): tiny resident slab ---------------
    include_bce = n_bce <= _BCE_IN_KERNEL_MAX
    if include_bce:
        rb = _round_up(_cdiv(n_bce, 128), 8)
        pad_b = rb * 128 - n_bce

        def _to_slab(a):
            flat = a.reshape(-1).astype(jnp.float32)
            if pad_b:
                flat = jnp.pad(flat, (0, pad_b))   # tiny; padding masked in-kernel
            return flat.reshape(rb, 128)

        bce_args = [_to_slab(pred), _to_slab(labels)]
        bce_specs = [pl.BlockSpec((rb, 128), lambda p, i: (0, 0))] * 2
    else:
        rb = 0
        bce_args, bce_specs = [], []

    # ---------------- pallas_call ---------------------------------------------------
    n_slots = 2 if include_bce else 1
    kernel = _make_kernel(tile_r=tile_r, chunk_r=chunk_r, lane_w=lane_w,
                          include_bce=include_bce, n_bce=n_bce,
                          pos_weight=pos_weight)

    big_spec = pl.BlockSpec((tile_r, lane_w), lambda p, i: (p * nt + i, 0))

    cost = pl.CostEstimate(
        flops=int(3 * n_kernel + 8 * n_bce),
        transcendentals=int(2 * n_bce if include_bce else 0),
        bytes_accessed=int(n_kernel * (jnp.dtype(reconstruct.dtype).itemsize
                                       + jnp.dtype(x_true.dtype).itemsize)
                           + 2 * rb * 128 * 4
                           + nsplit * n_slots * 8 * 128 * 4))

    partials = pl.pallas_call(
        kernel,
        out_shape=jax.ShapeDtypeStruct((nsplit, n_slots, 8, 128), jnp.float32),
        grid=(nsplit, nt),
        in_specs=[big_spec, big_spec] + bce_specs,
        out_specs=pl.BlockSpec((1, n_slots, 8, 128), lambda p, i: (p, 0, 0, 0)),
        compiler_params=pltpu.CompilerParams(
            # TODO(synk): on v7x, profile to confirm the leading axis is really sharded
            # across both TensorCores; if not, switch it to pltpu.CORE_PARALLEL (or use
            # pl.core_map over a tensorcore mesh with per-core row ranges).
            dimension_semantics=("parallel", "arbitrary"),
            vmem_limit_bytes=_VMEM_LIMIT_BYTES),
        cost_estimate=cost,
    )(recon2d, xtrue2d, *bce_args)

    mse = (jnp.sum(partials[:, 0]) + extra_sq) / n_recon
    if include_bce:
        bce = jnp.sum(partials[:, 1]) / n_bce
    else:
        bce = _bce_with_logits_mean(pred, labels, pos_weight)

    loss = recon_weight * mse + (1.0 - recon_weight) * bce
    # TODO(synk): PyTorch returns .item() for the two component losses; kept as
    # on-device scalars here to avoid a per-call device->host sync.
    return loss, mse, bce


if __name__ == "__main__":
    key = jax.random.PRNGKey(0)
    k1, k2, k3, k4, k5, k6, k7, k8 = jax.random.split(key, 8)

    recon_weight, class_weight = 0.7, 2.0   # class_weight == BCE pos_weight

    def ref_losses(reconstruct, pred, x_true, labels):
        ref_mse = jnp.mean((reconstruct.astype(jnp.float32)
                            - x_true.astype(jnp.float32)) ** 2)
        ref_bce = _bce_with_logits_mean(pred, labels, class_weight)
        ref_loss = recon_weight * ref_mse + (1.0 - recon_weight) * ref_bce
        return ref_loss, ref_mse, ref_bce

    def check(reconstruct, pred, x_true, labels, tol):
        loss, mse, bce = weighted_loss(
            reconstruct, pred, x_true, labels,
            recon_weight=recon_weight, class_weight=class_weight)
        jax.block_until_ready(loss)
        rl, rm, rb_ = ref_losses(reconstruct, pred, x_true, labels)
        assert abs(float(mse) - float(rm)) < tol, (float(mse), float(rm))
        assert abs(float(bce) - float(rb_)) < tol, (float(bce), float(rb_))
        assert abs(float(loss) - float(rl)) < tol, (float(loss), float(rl))
        return loss

    # Classification head used by all cases: (B, P) = (2, 1).
    pred = jax.random.normal(k3, (2, 1), dtype=jnp.float32)
    labels = jax.random.bernoulli(k4, 0.5, (2, 1)).astype(jnp.float32)

    # Case 1: tiny TCN-AE-like shapes (batch=2, channels=4, time=16), f32.
    rec1 = jax.random.normal(k1, (2, 4, 16), dtype=jnp.float32)
    xt1 = jax.random.normal(k2, (2, 4, 16), dtype=jnp.float32)
    out = check(rec1, pred, xt1, labels, tol=1e-5)

    # Case 2: unaligned element count -> exercises the ragged-tail / remainder path.
    rec2 = jax.random.normal(k5, (2, 4, 600), dtype=jnp.float32)
    xt2 = jax.random.normal(k6, (2, 4, 600), dtype=jnp.float32)
    check(rec2, pred, xt2, labels, tol=1e-5)

    # Case 3: bf16 inputs, large enough for multiple tiles and the chunked inner loop.
    rec3 = jax.random.normal(k7, (4, 16, 40000), dtype=jnp.bfloat16)
    xt3 = jax.random.normal(k8, (4, 16, 40000), dtype=jnp.bfloat16)
    check(rec3, pred, xt3, labels, tol=1e-4)

    jax.block_until_ready(out)
    print("KERNEL_OK")
</pallas_src>

<mosaic_0001>
module attributes {stable_mosaic.version = 11 : i64} {
  func.func @kernel(%arg0: i32, %arg1: i32, %arg2: memref<8x128xf32, #tpu.memory_space<vmem>>, %arg3: memref<8x128xf32, #tpu.memory_space<vmem>>, %arg4: memref<8x128xf32, #tpu.memory_space<vmem>>, %arg5: memref<8x128xf32, #tpu.memory_space<vmem>>, %arg6: memref<1x2x8x128xf32, #tpu.memory_space<vmem>>) attributes {dimension_semantics = [#tpu.dimension_semantics<parallel>, #tpu.dimension_semantics<arbitrary>], iteration_bounds = array<i64: 1, 1>, scalar_prefetch = 0 : i64, scratch_operands = 0 : i64, tpu.core_type = #tpu.core_type<tc>, window_params = [{transform_indices = @transform_0, window_bounds = array<i64: 8, 128>}, {transform_indices = @transform_1, window_bounds = array<i64: 8, 128>}, {pipeline_mode = #tpu.pipeline_mode<synchronous>, transform_indices = @transform_2, window_bounds = array<i64: 8, 128>}, {pipeline_mode = #tpu.pipeline_mode<synchronous>, transform_indices = @transform_3, window_bounds = array<i64: 8, 128>}, {transform_indices = @transform_4, window_bounds = array<i64: 1, 2, 8, 128>}]} {
    %c0_i32 = arith.constant 0 : i32
    %0 = arith.cmpi eq, %arg1, %c0_i32 : i32
    %1 = arith.extui %0 : i1 to i32
    %c0_i32_0 = arith.constant 0 : i32
    %2 = arith.cmpi ne, %1, %c0_i32_0 : i32
    scf.if %2 {
      %cst_15 = arith.constant 0.000000e+00 : f32
      %26 = vector.broadcast %cst_15 : f32 to vector<8x128xf32>
      %c0_16 = arith.constant 0 : index
      %c0_17 = arith.constant 0 : index
      %c0_18 = arith.constant 0 : index
      %c0_19 = arith.constant 0 : index
      %27 = vector.load %arg6[%c0_16, %c0_17, %c0_18, %c0_19] : memref<1x2x8x128xf32, #tpu.memory_space<vmem>>, vector<1x1x8x128xf32>
      %28 = vector.shape_cast %27 : vector<1x1x8x128xf32> to vector<8x128xf32>
      %29 = vector.shape_cast %26 : vector<8x128xf32> to vector<1x1x8x128xf32>
      tpu.vector_store %arg6[%c0_16, %c0_17, %c0_18, %c0_19], %29 {strides = array<i32>} : memref<1x2x8x128xf32, #tpu.memory_space<vmem>>, vector<1x1x8x128xf32>,
      %cst_20 = arith.constant 0.000000e+00 : f32
      %30 = vector.broadcast %cst_20 : f32 to vector<8x128xf32>
      %c0_21 = arith.constant 0 : index
      %c1 = arith.constant 1 : index
      %c0_22 = arith.constant 0 : index
      %c0_23 = arith.constant 0 : index
      %31 = vector.load %arg6[%c0_21, %c1, %c0_22, %c0_23] : memref<1x2x8x128xf32, #tpu.memory_space<vmem>>, vector<1x1x8x128xf32>
      %32 = vector.shape_cast %31 : vector<1x1x8x128xf32> to vector<8x128xf32>
      %33 = vector.shape_cast %30 : vector<8x128xf32> to vector<1x1x8x128xf32>
      tpu.vector_store %arg6[%c0_21, %c1, %c0_22, %c0_23], %33 {strides = array<i32>} : memref<1x2x8x128xf32, #tpu.memory_space<vmem>>, vector<1x1x8x128xf32>,
    } else {
    }
    %c0_i32_1 = arith.constant 0 : i32
    %3 = arith.cmpi eq, %arg1, %c0_i32_1 : i32
    %c0_i32_2 = arith.constant 0 : i32
    %4 = arith.cmpi eq, %arg0, %c0_i32_2 : i32
    %5 = arith.andi %3, %4 : i1
    %6 = arith.extui %5 : i1 to i32
    %c0_i32_3 = arith.constant 0 : i32
    %7 = arith.cmpi ne, %6, %c0_i32_3 : i32
    scf.if %7 {
      %c0_15 = arith.constant 0 : index
      %c0_16 = arith.constant 0 : index
      %26 = vector.load %arg4[%c0_15, %c0_16] : memref<8x128xf32, #tpu.memory_space<vmem>>, vector<8x128xf32>
      %c0_17 = arith.constant 0 : index
      %c0_18 = arith.constant 0 : index
      %27 = vector.load %arg5[%c0_17, %c0_18] : memref<8x128xf32, #tpu.memory_space<vmem>>, vector<8x128xf32>
      %cst_19 = arith.constant 0.000000e+00 : f32
      %28 = vector.broadcast %cst_19 : f32 to vector<8x128xf32>
      %29 = arith.subf %28, %26 : vector<8x128xf32>
      %cst_20 = arith.constant 0.000000e+00 : f32
      %30 = vector.broadcast %cst_20 : f32 to vector<8x128xf32>
      %31 = arith.maximumf %29, %30 : vector<8x128xf32>
      %32 = math.absf %26 : vector<8x128xf32>
      %cst_21 = arith.constant 0.000000e+00 : f32
      %33 = vector.broadcast %cst_21 : f32 to vector<8x128xf32>
      %34 = arith.subf %33, %32 : vector<8x128xf32>
      %35 = math.exp %34 : vector<8x128xf32>
      %36 = math.log1p %35 : vector<8x128xf32>
      %37 = arith.addf %31, %36 : vector<8x128xf32>
      %cst_22 = arith.constant 1.000000e+00 : f32
      %38 = vector.broadcast %cst_22 : f32 to vector<8x128xf32>
      %39 = arith.subf %38, %27 : vector<8x128xf32>
      %40 = arith.mulf %39, %26 : vector<8x128xf32>
      %cst_23 = arith.constant 1.000000e+00 : f32
      %41 = vector.broadcast %cst_23 : f32 to vector<8x128xf32>
      %42 = arith.mulf %41, %27 : vector<8x128xf32>
      %cst_24 = arith.constant 1.000000e+00 : f32
      %43 = vector.broadcast %cst_24 : f32 to vector<8x128xf32>
      %44 = arith.addf %43, %42 : vector<8x128xf32>
      %45 = arith.mulf %44, %37 : vector<8x128xf32>
      %46 = arith.addf %40, %45 : vector<8x128xf32>
      %47 = tpu.iota {dimensions = array<i32: 0>} : vector<8x128xi32>
      %48 = tpu.iota {dimensions = array<i32: 1>} : vector<8x128xi32>
      %c128_i32 = arith.constant 128 : i32
      %49 = vector.broadcast %c128_i32 : i32 to vector<8x128xi32>
      %50 = arith.muli %47, %49 : vector<8x128xi32>
      %51 = arith.addi %50, %48 : vector<8x128xi32>
      %c2_i32 = arith.constant 2 : i32
      %52 = vector.broadcast %c2_i32 : i32 to vector<8x128xi32>
      %53 = arith.cmpi slt, %51, %52 : vector<8x128xi32>
      %cst_25 = arith.constant 0.000000e+00 : f32
      %54 = vector.broadcast %cst_25 : f32 to vector<8x128xf32>
      %55 = arith.select %53, %46, %54 : vector<8x128xi1>, vector<8x128xf32>
      %56 = vector.shape_cast %55 : vector<8x128xf32> to vector<1x8x128xf32>
      %cst_26 = arith.constant dense<0.000000e+00> : vector<8x128xf32>
      %57 = vector.multi_reduction <add>, %56, %cst_26 [0] : vector<1x8x128xf32> to vector<8x128xf32>
      %c0_27 = arith.constant 0 : index
      %c1 = arith.constant 1 : index
      %c0_28 = arith.constant 0 : index
      %c0_29 = arith.constant 0 : index
      %58 = vector.load %arg6[%c0_27, %c1, %c0_28, %c0_29] : memref<1x2x8x128xf32, #tpu.memory_space<vmem>>, vector<1x1x8x128xf32>
      %59 = vector.shape_cast %58 : vector<1x1x8x128xf32> to vector<8x128xf32>
      %60 = vector.shape_cast %57 : vector<8x128xf32> to vector<1x1x8x128xf32>
      tpu.vector_store %arg6[%c0_27, %c1, %c0_28, %c0_29], %60 {strides = array<i32>} : memref<1x2x8x128xf32, #tpu.memory_space<vmem>>, vector<1x1x8x128xf32>,
    } else {
    }
    %c0 = arith.constant 0 : index
    %c0_4 = arith.constant 0 : index
    %c0_5 = arith.constant 0 : index
    %c0_6 = arith.constant 0 : index
    %8 = vector.load %arg6[%c0, %c0_4, %c0_5, %c0_6] : memref<1x2x8x128xf32, #tpu.memory_space<vmem>>, vector<1x1x8x128xf32>
    %9 = vector.shape_cast %8 : vector<1x1x8x128xf32> to vector<8x128xf32>
    %cst = arith.constant 0.000000e+00 : f32
    %10 = vector.broadcast %cst : f32 to vector<8x128xf32>
    %c0_i32_7 = arith.constant 0 : i32
    %c8_i32 = arith.constant 8 : i32
    %11 = arith.muli %c0_i32_7, %c8_i32 : i32
    %12 = tpu.assume_multiple %11, 8 : i32
    %13 = arith.index_cast %12 : i32 to index
    %c0_8 = arith.constant 0 : index
    %14 = vector.load %arg2[%13, %c0_8] : memref<8x128xf32, #tpu.memory_space<vmem>>, vector<8x128xf32>
    %15 = arith.index_cast %12 : i32 to index
    %c0_9 = arith.constant 0 : index
    %16 = vector.load %arg3[%15, %c0_9] : memref<8x128xf32, #tpu.memory_space<vmem>>, vector<8x128xf32>
    %17 = arith.subf %14, %16 : vector<8x128xf32>
    %18 = arith.mulf %17, %17 : vector<8x128xf32>
    %19 = vector.shape_cast %18 : vector<8x128xf32> to vector<1x8x128xf32>
    %cst_10 = arith.constant dense<0.000000e+00> : vector<8x128xf32>
    %20 = vector.multi_reduction <add>, %19, %cst_10 [0] : vector<1x8x128xf32> to vector<8x128xf32>
    %21 = arith.addf %10, %20 : vector<8x128xf32>
    %c1_i32 = arith.constant 1 : i32
    %22 = arith.addf %9, %21 : vector<8x128xf32>
    %c0_11 = arith.constant 0 : index
    %c0_12 = arith.constant 0 : index
    %c0_13 = arith.constant 0 : index
    %c0_14 = arith.constant 0 : index
    %23 = vector.load %arg6[%c0_11, %c0_12, %c0_13, %c0_14] : memref<1x2x8x128xf32, #tpu.memory_space<vmem>>, vector<1x1x8x128xf32>
    %24 = vector.shape_cast %23 : vector<1x1x8x128xf32> to vector<8x128xf32>
    %25 = vector.shape_cast %22 : vector<8x128xf32> to vector<1x1x8x128xf32>
    tpu.vector_store %arg6[%c0_11, %c0_12, %c0_13, %c0_14], %25 {strides = array<i32>} : memref<1x2x8x128xf32, #tpu.memory_space<vmem>>, vector<1x1x8x128xf32>,
    return
  }
  func.func @transform_0(%arg0: i32, %arg1: i32) -> (i32, i32) {
    %c1_i32 = arith.constant 1 : i32
    %0 = arith.muli %arg0, %c1_i32 : i32
    %1 = arith.addi %0, %arg1 : i32
    %c0_i32 = arith.constant 0 : i32
    %c0_i32_0 = arith.constant 0 : i32
    return %1, %c0_i32 : i32, i32
  }
  func.func @transform_1(%arg0: i32, %arg1: i32) -> (i32, i32) {
    %c1_i32 = arith.constant 1 : i32
    %0 = arith.muli %arg0, %c1_i32 : i32
    %1 = arith.addi %0, %arg1 : i32
    %c0_i32 = arith.constant 0 : i32
    %c0_i32_0 = arith.constant 0 : i32
    return %1, %c0_i32 : i32, i32
  }
  func.func @transform_2(%arg0: i32, %arg1: i32) -> (i32, i32) {
    %c0_i32 = arith.constant 0 : i32
    %c0_i32_0 = arith.constant 0 : i32
    %c0_i32_1 = arith.constant 0 : i32
    return %c0_i32, %c0_i32_0 : i32, i32
  }
  func.func @transform_3(%arg0: i32, %arg1: i32) -> (i32, i32) {
    %c0_i32 = arith.constant 0 : i32
    %c0_i32_0 = arith.constant 0 : i32
    %c0_i32_1 = arith.constant 0 : i32
    return %c0_i32, %c0_i32_0 : i32, i32
  }
  func.func @transform_4(%arg0: i32, %arg1: i32) -> (i32, i32, i32, i32) {
    %c0_i32 = arith.constant 0 : i32
    %c0_i32_0 = arith.constant 0 : i32
    %c0_i32_1 = arith.constant 0 : i32
    %c0_i32_2 = arith.constant 0 : i32
    return %arg0, %c0_i32, %c0_i32_0, %c0_i32_1 : i32, i32, i32, i32
  }
}

</mosaic_0001>

<bundles_post_ra>
// kernel: weighted_loss.1
= control target key start
LH: loop header
LB: loop body
LE: loop exit
PB: predicated region body
PF: predicated region fallthrough
CT: control target
= control target key end

     0   :  { %v86_v9 = vlaneseq  ;;  %s172_s2 = inlined_call_operand.vmem [shape: f32[8,128], index: 2, kind: input, shape index: {}]   ;;  %s173_s0 = inlined_call_operand.vmem [shape: f32[8,128], index: 0, kind: input, shape index: {}]   ;;  %s174_s1 = inlined_call_operand.vmem [shape: f32[8,128], index: 1, kind: input, shape index: {}]   ;;  %s175_s4 = inlined_call_operand.vmem [shape: f32[1,2,8,128], index: 4, kind: output, shape index: {}]   ;;  %s176_s3 = inlined_call_operand.vmem [shape: f32[8,128], index: 3, kind: input, shape index: {}]  }
   0x1   :  { %v63_v0 = vld [vmem:[%s172_s2] sm:$0xff] }
   0x2   :  { %v98_v1 = vld [vmem:[%s173_s0] sm:$0xff]  ;;  %v67_v2 = vand.u32 2147483647, %v63_v0  ;;  %v87_v13 = vshrl.u32 %v86_v9, 7  ;;  %v65_v14 = vsub.f32 0.0, %v63_v0  ;;  %v89_v18 = vand.u32 127, %v86_v9 }
   0x3   :  { %v99_v3 = vld [vmem:[%s174_s1] sm:$0xff] }
   0x4   :  { %v100_v4 = vsub.f32 %v98_v1, %v99_v3  ;;  %v68_v5 = vsub.f32 0.0, %v67_v2  ;;  %v64_v16 = vld [vmem:[%s176_s3] sm:$0xff]  ;;  %v90_v19 = vmul.u32 128, %v87_v13  ;;  %v66_v21 = vmax.f32 %v65_v14, 0.0 }
   0x5   :  { %v81_v22 = vsub.f32 1.0, %v64_v16  ;;  %v83_v24 = vadd.f32 1.0, %v64_v16 }
   0x6   :  { %v101_v6 = vmul.f32 %v100_v4, %v100_v4  ;;  %v69_v7 = vmul.f32 1.442695, %v68_v5  ;;  %v91_v26 = vadd.s32 %v90_v19, %v89_v18 }
   0x7   :  { %v82_v28 = vmul.f32 %v81_v22, %v63_v0 }
   0x8   :  { %125 = vpow2.f32 %v69_v7  ;;  %105 = vst [vmem:[%s175_s4] sm:$0xff] %v101_v6  ;;  %vm92_vm1 = vcmp.lt.s32.totalorder %v91_v26, 2 }
   0xe   :  { %v126_v8 = vpop.eup %125 }
   0xf   :  { %v71_v10 = vadd.f32 1.0, %v126_v8  ;;  %v74_v11 = vmul.f32 -0.5, %v126_v8  ;;  %v77_v15 = vand.u32 2147483647, %v126_v8 }
  0x11   :  { %127 = vlog2.f32 %v71_v10  ;;  %v75_v12 = vadd.f32 1.0, %v74_v11  ;;  %vm78_vm0 = vcmp.lt.f32.partialorder %v77_v15, 0.0004427343 }
  0x13   :  { %v76_v17 = vmul.f32 %v126_v8, %v75_v12 }
  0x17   :  { %v128_v20 = vpop.eup %127 }
  0x18   :  { %v73_v23 = vmul.f32 0.6931472, %v128_v20 }
  0x1a   :  { %v79_v25 = vsel %vm78_vm0, %v76_v17, %v73_v23 }
  0x1b   :  { %v80_v27 = vadd.f32 %v79_v25, %v66_v21 }
  0x1d   :  { %v84_v29 = vmul.f32 %v83_v24, %v80_v27 }
  0x1f   :  { %v85_v30 = vadd.f32 %v84_v29, %v82_v28 }
  0x21   :  { %v93_v31 = vsel %vm92_vm1, %v85_v30, 0.0 }
  0x22   :  { %123 = vst [vmem:[%s175_s4 + $0x8] sm:$0xff] %v93_v31 }

</bundles_post_ra>
